<compile_context>
chip_gen: v6e
topology: v6e:2x2x1
jax: 0.10.0
libtpu: 0.0.40
codegen_flags: <defaults>
</compile_context>

<pallas_src>
import jax
import jax.numpy as jnp
from jax import lax
from jax.experimental import pallas as pl
from jax.experimental.pallas import tpu as pltpu


_MAX_BLOCK_D = 2048   # lanes per feature chunk when tiling the reduction axis


def _round_up(v, m):
    return ((v + m - 1) // m) * m


def _vmem_tile_budget_bytes():
    """Generation-aware budget for the streamed x tile working set.

    v7x has only 64 MiB physical VMEM per TensorCore -> leave more headroom;
    v5e/v6e have 128 MiB physical and we raise the scoped limit explicitly via
    CompilerParams(vmem_limit_bytes=...).  Falls back to a conservative 12 MiB
    if the hardware query is unavailable.
    """
    try:
        cap = int(pltpu.get_tpu_info().vmem_capacity_bytes)
    except Exception:
        return 12 << 20
    if cap <= (64 << 20):
        return 20 << 20           # v7x
    return 24 << 20               # v5e / v6e


def _pick_tiles(B, D, x_itemsize):
    """Choose (block_rows, block_d) under the VMEM budget.

    Multi-tile dims are multiples of 128 (covers bf16/int8 sublane packing and
    keeps the lane-dense output store unmasked); single-tile dims use the full
    extent, which is always BlockSpec-legal.
    """
    budget = _vmem_tile_budget_bytes()
    # 2 x-tile buffers (native dtype) + up to 2 f32-sized elementwise temps
    # (upcast + product) in case the compiler materializes them.
    per_elem = 2 * x_itemsize + 8
    max_elems = max(budget // per_elem, 8 * 128)

    if B <= 128:
        # Small batch: one full-extent row tile; tile D only if it must.
        block_rows = B
        if B * D <= max_elems:
            block_d = D
        else:
            block_d = max(128, ((max_elems // max(B, 1)) // 128) * 128)
        return block_rows, block_d

    # Large batch: want >= 128-row tiles (lane-dense output slab).
    if 128 * D <= max_elems:
        block_d = D
    else:
        block_d = max(128, min(_MAX_BLOCK_D, ((max_elems // 256) // 128) * 128))
    tb = max(min(max_elems // block_d, 2048), 128)

    if B <= tb:
        if B >= 256:
            # Split so the grid has >= 2 row tiles -> v7x's 2nd TC gets work.
            block_rows = _round_up(pl.cdiv(B, 2), 128)
        else:
            block_rows = B        # 128 < B < 256: single full-extent tile
    else:
        block_rows = max(128, (tb // 128) * 128)
    return block_rows, block_d


def _make_ridge_kernel(D, block_d):
    ragged_d = (D % block_d) != 0

    def ridge_kernel(x_ref, w_ref, b_ref, o_ref, acc_ref):
        # x_ref:   (TB, TD) VMEM, native dtype (streamed)
        # w_ref:   (1, TD)  VMEM, f32 (resident weight row)
        # b_ref:   (1, 1)   SMEM, f32 (bias scalar)
        # o_ref:   (1, TB)  VMEM, lane-dense output row
        # acc_ref: (1, TB)  VMEM, f32 partial sums (resident across D axis)
        k = pl.program_id(1)

        @pl.when(k == 0)
        def _init():
            acc_ref[...] = jnp.zeros_like(acc_ref)

        x = x_ref[...].astype(jnp.float32)       # upcast fused into the VPU pipe
        prod = x * w_ref[...]                    # f32 multiply, weight stays f32
        if ragged_d:                             # mask OOB lanes of last D chunk
            lane = lax.broadcasted_iota(jnp.int32, prod.shape, 1)
            valid = D - k * block_d
            prod = jnp.where(lane < valid, prod, 0.0)
        part = jnp.sum(prod, axis=-1)            # lane reduce -> (TB,), f32
        acc_ref[...] += part[None, :]            # accumulate as lane-dense row

        @pl.when(k == pl.num_programs(1) - 1)
        def _finalize():
            o_ref[...] = (acc_ref[...] + b_ref[0, 0]).astype(o_ref.dtype)

    return ridge_kernel


def ridge_forward(x, weight, bias, *, block_rows=None, block_d=None):
    """RidgeRegression.forward: y = x @ W^T + b.

    x: (B, D) f32/bf16; weight: (1, D); bias: (1,)  ->  (B, 1) in x.dtype.
    Weight, bias and accumulation are kept in f32 regardless of x's dtype.
    """
    B, D = x.shape
    x_item = jnp.dtype(x.dtype).itemsize

    auto_rows, auto_d = _pick_tiles(B, D, x_item)
    block_rows = auto_rows if block_rows is None else int(block_rows)
    block_d = auto_d if block_d is None else int(block_d)

    # Normalize so every BlockSpec dim is either a 128-multiple or full-extent.
    if block_rows >= B:
        block_rows = B
    elif block_rows % 128 != 0:
        block_rows = min(_round_up(block_rows, 128), B)
    if block_d >= D:
        block_d = D
    elif block_d % 128 != 0:
        block_d = _round_up(block_d, 128)
        if block_d >= D:
            block_d = D

    n_row = pl.cdiv(B, block_rows)
    n_d = pl.cdiv(D, block_d)
    padded_b = n_row * block_rows

    w_row = weight.reshape(1, D).astype(jnp.float32)    # lane-dense f32 row
    b_smem = bias.reshape(1, 1).astype(jnp.float32)     # SMEM scalar

    out_item = jnp.dtype(x.dtype).itemsize
    cost = pl.CostEstimate(
        flops=2 * B * D,
        transcendentals=0,
        bytes_accessed=x_item * B * D + 4 * D + out_item * B + 4,
    )

    out = pl.pallas_call(
        _make_ridge_kernel(D, block_d),
        out_shape=jax.ShapeDtypeStruct((1, padded_b), x.dtype),
        grid_spec=pltpu.PrefetchScalarGridSpec(
            num_scalar_prefetch=0,
            grid=(n_row, n_d),                                # reduction axis last
            in_specs=[
                pl.BlockSpec((block_rows, block_d), lambda i, k: (i, k)),  # x tile
                pl.BlockSpec((1, block_d), lambda i, k: (0, k)),           # weight row
                pl.BlockSpec(memory_space=pltpu.MemorySpace.SMEM),         # bias
            ],
            out_specs=pl.BlockSpec((1, block_rows), lambda i, k: (0, i)),  # lane-dense slab
            scratch_shapes=[pltpu.VMEM((1, block_rows), jnp.float32)],     # f32 partial sums
        ),
        compiler_params=pltpu.CompilerParams(
            dimension_semantics=("parallel", "arbitrary"),
            vmem_limit_bytes=32 * 1024 * 1024,
        ),
        cost_estimate=cost,
    )(x, w_row, b_smem)

    # (1, padded_B) lane-dense slab -> (B, 1) column, dropping the pad rows.
    return out.reshape(-1)[:B].reshape(B, 1)


if __name__ == "__main__":
    key = jax.random.PRNGKey(0)
    k_x, k_w, k_b = jax.random.split(key, 3)

    batch, input_size = 8, 32
    alpha = 1.0  # TODO(synk): alpha (L2 penalty) only affects training, not forward.

    # Deterministic init mimicking nn.Linear: U(-1/sqrt(D), 1/sqrt(D)).
    bound = 1.0 / jnp.sqrt(jnp.float32(input_size))
    weight = jax.random.uniform(k_w, (1, input_size), jnp.float32, -bound, bound)
    bias = jax.random.uniform(k_b, (1,), jnp.float32, -bound, bound)
    x = jax.random.normal(k_x, (batch, input_size), jnp.float32)

    y = ridge_forward(x, weight, bias)
    jax.block_until_ready(y)
    y_ref = x @ weight.T + bias
    assert y.shape == (batch, 1)
    assert jnp.allclose(y, y_ref, atol=1e-5, rtol=1e-5)

    # Multi-row-tile grid with a ragged final row tile + lane-dense output slab.
    k_x2, k_w2, k_b2 = jax.random.split(jax.random.PRNGKey(1), 3)
    B2, D2 = 300, 64
    w2 = jax.random.uniform(k_w2, (1, D2), jnp.float32, -0.1, 0.1)
    b2 = jax.random.uniform(k_b2, (1,), jnp.float32, -0.1, 0.1)
    x2 = jax.random.normal(k_x2, (B2, D2), jnp.float32)
    y2 = ridge_forward(x2, w2, b2, block_rows=128)
    jax.block_until_ready(y2)
    assert jnp.allclose(y2, x2 @ w2.T + b2, atol=1e-5, rtol=1e-5)

    # D-tiled accumulation path with a ragged (masked) final feature chunk.
    k_x3, k_w3, k_b3 = jax.random.split(jax.random.PRNGKey(2), 3)
    B3, D3 = 64, 300
    w3 = jax.random.uniform(k_w3, (1, D3), jnp.float32, -0.1, 0.1)
    b3 = jax.random.uniform(k_b3, (1,), jnp.float32, -0.1, 0.1)
    x3 = jax.random.normal(k_x3, (B3, D3), jnp.float32)
    y3 = ridge_forward(x3, w3, b3, block_d=128)
    jax.block_until_ready(y3)
    assert jnp.allclose(y3, x3 @ w3.T + b3, atol=1e-4, rtol=1e-4)

    # bf16 activations: f32 weight / accumulation, bf16 output.
    xb = x2.astype(jnp.bfloat16)
    yb = ridge_forward(xb, w2, b2)
    jax.block_until_ready(yb)
    yb_ref = xb.astype(jnp.float32) @ w2.T + b2
    assert jnp.allclose(yb.astype(jnp.float32), yb_ref, atol=2e-2, rtol=2e-2)

    print("KERNEL_OK")
</pallas_src>

<mosaic_0001>
module attributes {stable_mosaic.version = 11 : i64} {
  func.func @ridge_kernel(%arg0: i32, %arg1: i32, %arg2: memref<8x32xf32, #tpu.memory_space<vmem>>, %arg3: memref<1x32xf32, #tpu.memory_space<vmem>>, %arg4: memref<1x1xf32, #tpu.memory_space<smem>>, %arg5: memref<1x8xf32, #tpu.memory_space<vmem>>, %arg6: memref<1x8xf32, #tpu.memory_space<vmem>>) attributes {dimension_semantics = [#tpu.dimension_semantics<parallel>, #tpu.dimension_semantics<arbitrary>], iteration_bounds = array<i64: 1, 1>, scalar_prefetch = 0 : i64, scratch_operands = 1 : i64, tpu.core_type = #tpu.core_type<tc>, window_params = [{transform_indices = @transform_0, window_bounds = array<i64: 8, 32>}, {transform_indices = @transform_1, window_bounds = array<i64: 1, 32>}, {transform_indices = @transform_2, window_bounds = array<i64: 1, 1>}, {transform_indices = @transform_3, window_bounds = array<i64: 1, 8>}]} {
    %c0_i32 = arith.constant 0 : i32
    %0 = arith.cmpi eq, %arg1, %c0_i32 : i32
    %1 = arith.extui %0 : i1 to i32
    %c0_i32_0 = arith.constant 0 : i32
    %2 = arith.cmpi ne, %1, %c0_i32_0 : i32
    scf.if %2 {
      %cst_10 = arith.constant 0.000000e+00 : f32
      %15 = vector.broadcast %cst_10 : f32 to vector<1x8xf32>
      %c0_11 = arith.constant 0 : index
      %c0_12 = arith.constant 0 : index
      %16 = vector.load %arg6[%c0_11, %c0_12] : memref<1x8xf32, #tpu.memory_space<vmem>>, vector<1x8xf32>
      tpu.vector_store %arg6[%c0_11, %c0_12], %15 {strides = array<i32>} : memref<1x8xf32, #tpu.memory_space<vmem>>, vector<1x8xf32>,
    } else {
    }
    %c0 = arith.constant 0 : index
    %c0_1 = arith.constant 0 : index
    %3 = vector.load %arg2[%c0, %c0_1] : memref<8x32xf32, #tpu.memory_space<vmem>>, vector<8x32xf32>
    %c0_2 = arith.constant 0 : index
    %c0_3 = arith.constant 0 : index
    %4 = vector.load %arg3[%c0_2, %c0_3] : memref<1x32xf32, #tpu.memory_space<vmem>>, vector<1x32xf32>
    %5 = vector.broadcast %4 : vector<1x32xf32> to vector<8x32xf32>
    %6 = arith.mulf %3, %5 : vector<8x32xf32>
    %cst = arith.constant dense<0.000000e+00> : vector<8xf32>
    %7 = vector.multi_reduction <add>, %6, %cst [1] : vector<8x32xf32> to vector<8xf32>
    %c0_4 = arith.constant 0 : index
    %c0_5 = arith.constant 0 : index
    %8 = vector.load %arg6[%c0_4, %c0_5] : memref<1x8xf32, #tpu.memory_space<vmem>>, vector<1x8xf32>
    %9 = vector.shape_cast %7 : vector<8xf32> to vector<1x8xf32>
    %10 = arith.addf %8, %9 : vector<1x8xf32>
    %c0_6 = arith.constant 0 : index
    %c0_7 = arith.constant 0 : index
    %11 = vector.load %arg6[%c0_6, %c0_7] : memref<1x8xf32, #tpu.memory_space<vmem>>, vector<1x8xf32>
    tpu.vector_store %arg6[%c0_6, %c0_7], %10 {strides = array<i32>} : memref<1x8xf32, #tpu.memory_space<vmem>>, vector<1x8xf32>,
    %c0_i32_8 = arith.constant 0 : i32
    %12 = arith.cmpi eq, %arg1, %c0_i32_8 : i32
    %13 = arith.extui %12 : i1 to i32
    %c0_i32_9 = arith.constant 0 : i32
    %14 = arith.cmpi ne, %13, %c0_i32_9 : i32
    scf.if %14 {
      %c0_10 = arith.constant 0 : index
      %c0_11 = arith.constant 0 : index
      %15 = vector.load %arg6[%c0_10, %c0_11] : memref<1x8xf32, #tpu.memory_space<vmem>>, vector<1x8xf32>
      %c0_12 = arith.constant 0 : index
      %c0_13 = arith.constant 0 : index
      %16 = memref.load %arg4[%c0_12, %c0_13] : memref<1x1xf32, #tpu.memory_space<smem>>
      %17 = vector.broadcast %16 : f32 to vector<1x8xf32>
      %18 = arith.addf %15, %17 : vector<1x8xf32>
      %c0_14 = arith.constant 0 : index
      %c0_15 = arith.constant 0 : index
      %19 = vector.load %arg5[%c0_14, %c0_15] : memref<1x8xf32, #tpu.memory_space<vmem>>, vector<1x8xf32>
      tpu.vector_store %arg5[%c0_14, %c0_15], %18 {strides = array<i32>} : memref<1x8xf32, #tpu.memory_space<vmem>>, vector<1x8xf32>,
    } else {
    }
    return
  }
  func.func @transform_0(%arg0: i32, %arg1: i32) -> (i32, i32) {
    %c0_i32 = arith.constant 0 : i32
    return %arg0, %arg1 : i32, i32
  }
  func.func @transform_1(%arg0: i32, %arg1: i32) -> (i32, i32) {
    %c0_i32 = arith.constant 0 : i32
    %c0_i32_0 = arith.constant 0 : i32
    return %c0_i32, %arg1 : i32, i32
  }
  func.func @transform_2(%arg0: i32, %arg1: i32) -> (i32, i32) {
    %c0_i32 = arith.constant 0 : i32
    %c0_i32_0 = arith.constant 0 : i32
    %c0_i32_1 = arith.constant 0 : i32
    return %c0_i32, %c0_i32_0 : i32, i32
  }
  func.func @transform_3(%arg0: i32, %arg1: i32) -> (i32, i32) {
    %c0_i32 = arith.constant 0 : i32
    %c0_i32_0 = arith.constant 0 : i32
    return %c0_i32, %arg0 : i32, i32
  }
}

</mosaic_0001>

<bundles_post_ra>
// kernel: tpu_custom_call.1
= control target key start
LH: loop header
LB: loop body
LE: loop exit
PB: predicated region body
PF: predicated region fallthrough
CT: control target
= control target key end

     0   :  { %9 = vsyncpa [#allocation5], 0  ;;  %s271_s0 = inlined_call_operand.hbm [shape: f32[8,32], index: 0, kind: input, shape index: {}]   ;;  %s272_s1 = inlined_call_operand.vmem [shape: f32[1,32], index: 1, kind: input, shape index: {}]   ;;  %s273_s2 = inlined_call_operand.<no memory space> [shape: f32[1,1], index: 2, kind: input, shape index: {}]   ;;  %s274_s3 = inlined_call_operand.hbm [shape: f32[1,8], index: 3, kind: output, shape index: {}]  }
   0x1   :  { %10 = vsyncpa [#allocation6], 0  ;;  %s231_s12 = smov [#allocation4]  }
   0x2   :  { %s17_s13 = sshll.u32 %s231_s12, 4  ;;  %s18_s13 = int_to_ptr.vmem [resolvable:$true] %s17_s13 }
   0x3   :  { %s195_s14 = scalar_lea.vmem %s18_s13, 128  ;;  %p200_p1 = scmp.lt.s32.totalorder %s18_s13, %s18_s13 }
   0x4   :  { %p196_p0 = scmp.ne.s32.totalorder %s18_s13, %s195_s14  ;;  %p201_p2 = scmp.lt.s32.totalorder %s195_s14, %s195_s14 }
   0x6   :  { %p202_p3 = por %p201_p2, %p200_p1 }
   0x8   :  { %p203_p4 = pnand %p202_p3, %p196_p0 }
   0xa   :  { %206 = shalt.err (!%p203_p4)
}
   0xb   :  { %20 = dma.hbm_to_vmem [thread:$0]  %s271_s0, 128, %s18_s13, [#allocation5]  }
   0xc   :  { %227 = dma.done.wait [#allocation5], 128  }
   0xd   :  { %228 = vsyncadd [#allocation5], 4294967168  ;;  %v34_v0 = vld [vmem:[#allocation4] sm:$0xff]  ;;  %v180_v1 = vld [vmem:[%s272_s1] ss:$0 sm:$0xff]  ;;  %vm43_vm0 = vcmask 261120   ;;  %v49_v5 = vlaneseq  ;;  %v162_v50 = vstv %s273_s2 }
   0xe   :  { %v42_v2 = vmul.f32 %v180_v1, %v34_v0  ;;  %v232_v4 = vmov 0   ;;  %v233_v9 = vmov 1966171168   ;;  %vm32_vm1 = vcmask 57344   ;;  %s235_s19 = smov [#allocation7]  }
   0xf   :  { %186 = vset.pattern.permute.xlu0 %v232_v4  ;;  %v50_v6 = vshrl.u32 %v49_v5, 7  ;;  %v134_v7 = vand.u32 127, %v49_v5  ;;  %v86_v10 = vunpack.c.l.s4 %v233_v9  ;;  %v234_v40 = vmov 0.0   ;;  %s171_s20 = sshll.u32 %s235_s19, 4  ;;  %s172_s20 = int_to_ptr.vmem [resolvable:$true] %s171_s20 }
  0x10   :  { %v44_v3 = vsel %vm43_vm0, %v42_v2, 0.0  ;;  %33 = vst.msk [vmem:[#allocation2] sm:$0x1] %vm32_vm1, %v234_v40  ;;  %s207_s21 = scalar_lea.vmem %s172_s20, 16  ;;  %s211_s22 = scalar_lea.vmem %s172_s20, 32 }
  0x11   :  { %45 = vadd.xlane.f32.xlu0 %v44_v3  ;;  %v137_v8 = vsub.s32 %v134_v7, %v50_v6  ;;  %v87_v11 = vunpack.c.0.s8 %v86_v10  ;;  %v51_v12 = vsub.s32 0, %v50_v6  ;;  %v55_v13 = vsub.s32 1, %v50_v6  ;;  %p208_p5 = scmp.ne.s32.totalorder %s172_s20, %s207_s21  ;;  %p212_p6 = scmp.lt.s32.totalorder %s172_s20, %s172_s20 }
  0x12   :  { %v59_v14 = vsub.s32 2, %v50_v6  ;;  %v63_v15 = vsub.s32 3, %v50_v6  ;;  %v67_v16 = vsub.s32 4, %v50_v6  ;;  %v71_v17 = vsub.s32 5, %v50_v6  ;;  %p213_p7 = scmp.lt.s32.totalorder %s211_s22, %s207_s21 }
  0x13   :  { %v75_v18 = vsub.s32 6, %v50_v6  ;;  %v79_v19 = vsub.s32 7, %v50_v6  ;;  %v90_v21 = vsub.s32 %v87_v11, %v50_v6 }
  0x14   :  { %p214_p8 = por %p213_p7, %p212_p6 }
  0x16   :  { %p215_p9 = pnand %p214_p8, %p208_p5 }
  0x17   :  { %v47_v47 = vld [vmem:[#allocation2] sm:$0x1] }
  0x9a   :  { %v46_v20 = vpop.xlane.xlu0 %45 }
  0x9b   :  { %v52_v22 = vrot.slane %v46_v20, %v51_v12  ;;  %v56_v23 = vrot.slane %v46_v20, %v55_v13  ;;  %v60_v24 = vrot.slane %v46_v20, %v59_v14  ;;  %v64_v25 = vrot.slane %v46_v20, %v63_v15 }
  0x9c   :  { %v68_v26 = vrot.slane %v46_v20, %v67_v16  ;;  %v72_v27 = vrot.slane %v46_v20, %v71_v17  ;;  %v76_v28 = vrot.slane %v46_v20, %v75_v18  ;;  %v80_v29 = vrot.slane %v46_v20, %v79_v19 }
  0x9d   :  { %v81_v30 = vcombine.low %v52_v22, %v56_v23  ;;  %v82_v31 = vcombine.low %v60_v24, %v64_v25 }
  0x9e   :  { %v83_v32 = vcombine.low %v68_v26, %v72_v27  ;;  %v84_v33 = vcombine.low %v76_v28, %v80_v29 }
  0x9f   :  { %v91_v34 = vrot.slane %v81_v30, %v90_v21  ;;  %v98_v35 = vrot.slane %v82_v31, %v90_v21 }
  0xa0   :  { %v105_v36 = vrot.slane %v83_v32, %v90_v21  ;;  %v112_v37 = vrot.slane %v84_v33, %v90_v21 }
  0xa1   :  { %v113_v38 = vcombine.low %v91_v34, %v98_v35 }
  0xa2   :  { %v114_v39 = vcombine.low %v105_v36, %v112_v37 }
  0xa3   :  { %v121_v41 = vrot.slane %v113_v38, %v90_v21 }
  0xa4   :  { %v128_v42 = vrot.slane %v114_v39, %v90_v21 }
  0xa6   :  { %v129_v43 = vcombine.low %v121_v41, %v128_v42 }
  0xa8   :  { %131 = vperm.xlu0 %186, %v129_v43  }
 0x123   :  { %v132_v44 = vpop.permute.xlu0 %131 }
 0x124   :  { %v138_v45 = vrot.slane %v132_v44, %v137_v8 }
 0x126   :  { %v145_v46 = vrot.slane %v138_v45, %v90_v21 }
 0x128   :  { %v152_v48 = vrot.slane %v145_v46, %v90_v21 }
 0x12a   :  { %v154_v49 = vadd.f32 %v152_v48, %v47_v47 }
 0x12c   :  { %156 = vst.msk [vmem:[#allocation2] sm:$0x1] %vm32_vm1, %v154_v49 }
 0x133   :  { %v160_v51 = vld [vmem:[#allocation2] sm:$0x1] }
 0x134   :  { %v163_v52 = vadd.f32 %v162_v50, %v160_v51 }
 0x136   :  { %164 = vst.msk [vmem:[#allocation7] sm:$0x1] %vm32_vm1, %v163_v52 }
 0x137   :  { %218 = shalt.err (!%p215_p9)
}
 0x138   :  { %174 = dma.vmem_to_hbm [thread:$0]  %s172_s20, 16, %s274_s3, [#allocation6]  }
 0x139   :  { %229 = dma.done.wait [#allocation6], 16  }
 0x13a   :  { %230 = vsyncadd [#allocation6], 4294967280 }
 0x13b   :  { %178 = vsyncpa [#allocation5], 1 }
 0x13c   :  { %179 = vsyncpa [#allocation6], 1 }

</bundles_post_ra>
